<compile_context>
chip_gen: v5e
topology: v5e:2x2
jax: 0.10.0
libtpu: 0.0.40
codegen_flags: <defaults>
</compile_context>

<pallas_src>
import jax
import jax.numpy as jnp
from jax.experimental import pallas as pl
from jax.experimental.pallas import tpu as pltpu

_LANE = 128                          # full vreg lane width -> unmasked stores
_BLOCK_BYTES_CAP = 4 * 1024 * 1024   # per-operand block cap (see VMEM math above)
_VMEM_LIMIT_BYTES = 32 * 1024 * 1024  # explicit scoped-VMEM limit (v5e-safe headroom)


def _identity_kernel(x_ref, o_ref):
    # BaseVAE.forward is abstract; the concrete semantics reduce to passing
    # the input through unchanged.
    # TODO(synk): a per-block pltpu.make_async_copy HBM->HBM (memory_space=pl.ANY)
    # would skip the VMEM roundtrip entirely; kept as a simple VMEM copy for
    # robustness since HBM bandwidth binds either way.
    o_ref[...] = x_ref[...]


def _sublane_align(itemsize: int) -> int:
    """Native-tile sublane multiple: 8 for 32-bit, 16 for 16-bit, 32 for 8-bit."""
    return max(8, 8 * (4 // max(itemsize, 1)))


def _plan(rows: int, itemsize: int):
    """Choose (grid, block_rows, padded_rows) for a lane-dense (rows, 128) copy.

    Blocks are multiples of the dtype-native sublane tile, capped at
    _BLOCK_BYTES_CAP per operand.  For inputs large enough to hold >= 4
    aligned blocks, the grid is rounded up to an even count >= 4 so v7x's two
    TensorCores each get >= 2 steps (balanced, with read/write overlap).
    Rows are padded up so every block is full-size and aligned.
    """
    align = _sublane_align(itemsize)
    row_bytes = _LANE * itemsize
    br_cap = max(align, (_BLOCK_BYTES_CAP // row_bytes) // align * align)

    g = pl.cdiv(rows, br_cap)
    if rows >= 4 * align:
        g = max(g, 4)          # >= 2 steps per v7x TensorCore
        if g % 2:
            g += 1             # even split across the two cores
    else:
        g = 1                  # tiny input: single aligned block, minimal padding

    br = align * pl.cdiv(pl.cdiv(rows, g), align)
    padded_rows = g * br
    return g, br, padded_rows


def base_vae_forward(x: jax.Array, *, force_pallas: bool = False) -> jax.Array:
    """Pallas implementation of BaseVAE's (abstract) forward: identity.

    Default path elides the copy entirely (zero device work).  With
    force_pallas=True the bytes are routed through a lane-dense, VMEM-budgeted
    Pallas copy kernel (API-parity / tiling-test path).  For the
    input_output_aliases to actually save an HBM allocation, donate x under jit.
    """
    if not force_pallas:
        # Perf review: the single biggest optimization for an identity forward
        # is to not launch a kernel at all.
        return x

    total = x.size
    if total == 0:
        return x
    itemsize = jnp.dtype(x.dtype).itemsize

    rows = pl.cdiv(total, _LANE)
    g, br, padded_rows = _plan(rows, itemsize)
    padded_total = padded_rows * _LANE

    flat = x.reshape(-1)
    if padded_total != total:
        flat = jnp.pad(flat, (0, padded_total - total))
    x2 = flat.reshape(padded_rows, _LANE)  # lane-dense 2D view (last dim = 128)

    y2 = pl.pallas_call(
        _identity_kernel,
        out_shape=jax.ShapeDtypeStruct((padded_rows, _LANE), x.dtype),
        grid=(g,),
        in_specs=[pl.BlockSpec((br, _LANE), lambda i: (i, 0))],
        out_specs=pl.BlockSpec((br, _LANE), lambda i: (i, 0)),
        input_output_aliases={0: 0},
        cost_estimate=pl.CostEstimate(
            flops=0,
            transcendentals=0,
            bytes_accessed=2 * padded_total * itemsize,
        ),
        compiler_params=pltpu.CompilerParams(
            dimension_semantics=("parallel",),
            vmem_limit_bytes=_VMEM_LIMIT_BYTES,
        ),
    )(x2)

    y = y2.reshape(-1)
    if padded_total != total:
        y = y[:total]
    return y.reshape(x.shape)


# TODO(synk): encode / decode / sample / generate / loss_function are abstract
# in BaseVAE (raise NotImplementedError / no body); implement them in the
# concrete SWAE subclass kernels, reusing this lane-dense layout and
# generation-safe VMEM-budgeted block planning.


if __name__ == "__main__":
    key = jax.random.PRNGKey(0)
    k1, k2 = jax.random.split(key)

    # Small NCHW image tensor consistent with the VAE convention.
    x = jax.random.normal(k1, (2, 4, 16, 16), dtype=jnp.float32)
    # Awkward, non-128-divisible shape + sub-32-bit dtype to exercise the
    # padded lane-dense path with (16,128) bf16 native tiles.
    z = jax.random.normal(k2, (3, 5, 7), dtype=jnp.bfloat16)

    # Default (elided) path: zero device work.
    y0 = jax.block_until_ready(base_vae_forward(x))
    assert y0.shape == x.shape and y0.dtype == x.dtype
    assert bool(jnp.array_equal(y0, x))

    # Forced Pallas path on the image tensor.
    y1 = jax.block_until_ready(base_vae_forward(x, force_pallas=True))
    assert y1.shape == x.shape and y1.dtype == x.dtype
    assert bool(jnp.array_equal(y1, x))

    # Forced Pallas path on the awkward bf16 tensor (pads, copies, slices back).
    y2 = jax.block_until_ready(base_vae_forward(z, force_pallas=True))
    assert y2.shape == z.shape and y2.dtype == z.dtype
    assert bool(jnp.array_equal(y2, z))

    print("KERNEL_OK")
</pallas_src>

<mosaic_0001>
module attributes {stable_mosaic.version = 11 : i64} {
  func.func @_identity_kernel(%arg0: i32, %arg1: memref<16x128xf32, #tpu.memory_space<vmem>>, %arg2: memref<16x128xf32, #tpu.memory_space<vmem>>) attributes {dimension_semantics = [#tpu.dimension_semantics<parallel>], iteration_bounds = array<i64: 1>, scalar_prefetch = 0 : i64, scratch_operands = 0 : i64, tpu.core_type = #tpu.core_type<tc>, window_params = [{transform_indices = @transform_0, window_bounds = array<i64: 16, 128>}, {transform_indices = @transform_1, window_bounds = array<i64: 16, 128>}]} {
    %c0 = arith.constant 0 : index
    %c0_0 = arith.constant 0 : index
    %0 = vector.load %arg1[%c0, %c0_0] : memref<16x128xf32, #tpu.memory_space<vmem>>, vector<16x128xf32>
    %c0_1 = arith.constant 0 : index
    %c0_2 = arith.constant 0 : index
    %1 = vector.load %arg2[%c0_1, %c0_2] : memref<16x128xf32, #tpu.memory_space<vmem>>, vector<16x128xf32>
    tpu.vector_store %arg2[%c0_1, %c0_2], %0 {strides = array<i32>} : memref<16x128xf32, #tpu.memory_space<vmem>>, vector<16x128xf32>,
    return
  }
  func.func @transform_0(%arg0: i32) -> (i32, i32) {
    %c0_i32 = arith.constant 0 : i32
    %c0_i32_0 = arith.constant 0 : i32
    return %arg0, %c0_i32 : i32, i32
  }
  func.func @transform_1(%arg0: i32) -> (i32, i32) {
    %c0_i32 = arith.constant 0 : i32
    %c0_i32_0 = arith.constant 0 : i32
    return %arg0, %c0_i32 : i32, i32
  }
}

</mosaic_0001>

<bundles_post_ra>
// kernel: tpu_custom_call.1
= control target key start
LH: loop header
LB: loop body
LE: loop exit
PB: predicated region body
PF: predicated region fallthrough
CT: control target
= control target key end

     0   :  { %6 = vsyncpa [#allocation3], 0  ;;  %s124_s0 = inlined_call_operand.hbm [shape: f32[16,128], index: 0, kind: input, shape index: {}, may-alias: {0,1}]   ;;  %s125_s1 = inlined_call_operand.hbm [shape: f32[16,128], index: 1, kind: output, shape index: {}, may-alias: {0,1}]  }
   0x1   :  { %7 = vsyncpa [#allocation4], 0  ;;  %s12_s8 = sshll.u32 %s124_s0, 4  ;;  %s104_s9 = smov [#allocation2]   ;;  %s13_s8 = int_to_ptr.hbm [resolvable:$true] %s12_s8 }
   0x2   :  { %s14_s10 = sshll.u32 %s104_s9, 4  ;;  %s105_s11 = smov 128   ;;  %s15_s10 = int_to_ptr.vmem [resolvable:$true] %s14_s10 }
   0x3   :  { %s106_s12 = smov 8  }
   0x4   :  { %20 = dma.hbm_to_vmem [thread:$0]  %s13_s8, 256, %s15_s10, [#allocation3], %s105_s11, %s105_s11, %s106_s12  }
   0x5   :  { %100 = dma.done.wait [#allocation3], 256  }
   0x6   :  { %101 = vsyncadd [#allocation3], 4294967040  ;;  %s107_s13 = smov [#allocation5]   ;;  %s35_s17 = sshll.u32 %s125_s1, 4  ;;  %v25_v0 = vld [vmem:[#allocation2] sm:$0xff]  ;;  %v26_v1 = vld [vmem:[#allocation2 + $0x8] sm:$0xff]  ;;  %s36_s17 = int_to_ptr.hbm [resolvable:$true] %s35_s17 }
   0x7   :  { %s33_s14 = sshll.u32 %s107_s13, 4  ;;  %27 = vst [vmem:[#allocation5] sm:$0xff] %v25_v0  ;;  %s34_s14 = int_to_ptr.vmem [resolvable:$true] %s33_s14 }
   0x8   :  { %28 = vst [vmem:[#allocation5 + $0x8] sm:$0xff] %v26_v1 }
   0x9   :  { %41 = dma.vmem_to_hbm [thread:$0]  %s34_s14, 256, %s36_s17, [#allocation4], %s105_s11, %s105_s11, %s106_s12  }
   0xa   :  { %102 = dma.done.wait [#allocation4], 256  }
   0xb   :  { %103 = vsyncadd [#allocation4], 4294967040 }
   0xc   :  { %46 = vsyncpa [#allocation3], 1 }
   0xd   :  { %47 = vsyncpa [#allocation4], 1 }

</bundles_post_ra>
